<compile_context>
chip_gen: v7x
topology: tpu7x:2x2x1
jax: 0.10.0
libtpu: 0.0.40
codegen_flags: <defaults>
</compile_context>

<pallas_src>
import numpy as np
import jax
import jax.numpy as jnp
from jax.experimental import pallas as pl
from jax.experimental.pallas import tpu as pltpu

LEAK = 0.01          # nn.LeakyReLU() default negative_slope
EPS = 1e-5           # nn.BatchNorm2d default eps
DILATIONS = (12, 24, 36)
LAST_OFFS = tuple((dy, dx) for dy in (-1, 0, 1) for dx in (-1, 0, 1))


def _lrelu(x):
    return jnp.where(x > 0, x, LEAK * x)


def _round_up(v, m):
    return ((v + m - 1) // m) * m


def _compute_taps(H, W, dilations):
    """Union of contributing (dy, dx) tap offsets of the 1x1 + dilated 3x3
    branches.  Taps whose shifted window lies fully outside the image
    (|offset| >= H or >= W) contribute only zeros and are dropped."""
    taps = {(0, 0)}
    for d in dilations:
        offs_y = [o for o in (-d, 0, d) if abs(o) < H]
        offs_x = [o for o in (-d, 0, d) if abs(o) < W]
        for oy in offs_y:
            for ox in offs_x:
                taps.add((oy, ox))
    return sorted(taps)


# ----------------------------------------------------------------------------
# Kernel: one grid step = `nb` batch elements; all tensors are (C, H*W) with
# spatial on lanes.
# ----------------------------------------------------------------------------
def make_aspp_kernel(H, W, taps, nb):
    hw = H * W

    def shifted(arr, oy, ox):
        # result[:, p] = arr[:, (p + oy*W + ox) mod HW]  (lane rotation, XLU)
        s = oy * W + ox
        if s % hw == 0:
            return arr
        return pltpu.roll(arr, (-s) % hw, axis=1)

    def kernel(x_ref, wcat_ref, mapb_ref, wred_ref, wgp_ref, gpb_ref,
               wpred_ref, redb_ref, wlast_ref, m1_ref, out_ref):
        cdt = wcat_ref.dtype                       # matmul operand dtype
        for b in range(nb):                        # static unroll over batch
            x8 = x_ref[b]                          # (cin_p, HW) f32

            # ---- fused map_convs: rolls + one mask multiply + one matmul ---
            blocks = [shifted(x8, oy, ox) for (oy, ox) in taps]
            patches = (jnp.concatenate(blocks, axis=0) * m1_ref[...]).astype(cdt)
            cat = jnp.dot(wcat_ref[...], patches,
                          preferred_element_type=jnp.float32)    # (4*hid, HW)
            cat = _lrelu(cat + mapb_ref[...])                    # map_bn folded

            # ---- red_conv (red_bn scale folded into wred) -------------------
            red = jnp.dot(wred_ref[...], cat.astype(cdt),
                          preferred_element_type=jnp.float32)    # (cout_p, HW)

            # ---- global-pool branch on VPU/XLU (no M=1 matmuls) --------------
            mean_x = jnp.mean(x8, axis=1, keepdims=True)          # (cin_p, 1)
            gp = jnp.sum(wgp_ref[...] * mean_x, axis=0, keepdims=True)   # (1, hid)
            gp = _lrelu(gp + gpb_ref[...])
            pvec = jnp.sum(wpred_ref[...] * gp, axis=1, keepdims=True)   # (cout_p, 1)

            mid = _lrelu(red + pvec + redb_ref[...])              # (cout_p, HW)

            # ---- last_conv 3x3 (centre-aligned): rolls + one matmul ---------
            # Border columns hold wrapped garbage; the wrapper slices the
            # valid 14x14 interior, so no mask is needed here.
            blocks2 = [shifted(mid, dy, dx) for (dy, dx) in LAST_OFFS]
            patches2 = jnp.concatenate(blocks2, axis=0).astype(cdt)
            out_ref[b] = jnp.dot(wlast_ref[...], patches2,
                                 preferred_element_type=jnp.float32)  # (cout_p, HW)

    return kernel


# ----------------------------------------------------------------------------
# Wrapper: NCHW in/out, PyTorch-layout params; BN folding and weight
# re-orientation are one-time host-side glue.
# ----------------------------------------------------------------------------
def aspp_pallas(x_nchw, P, hidden, out_ch, compute_dtype=jnp.float32):
    # TODO(synk): the pooling_size != None eval path (avg_pool2d + replicate
    # pad) and training-mode BatchNorm (batch statistics) are not implemented;
    # this matches the module with pooling_size=None in eval mode.
    N, Cin, H, W = x_nchw.shape
    HW = H * W
    taps = _compute_taps(H, W, DILATIONS)
    T = len(taps)
    cin_p = _round_up(Cin, 8)
    cout_p = _round_up(out_ch, 8)
    hid4 = 4 * hidden

    # Batch elements per grid step: amortise per-step overhead, but keep at
    # least two grid steps so both v7x TensorCores get work.
    nb = next((d for d in range(N, 0, -1) if N % d == 0 and N // d >= 2), 1)
    grid_n = N // nb

    # Channels-on-sublanes, spatial-on-lanes input layout (N, cin_p, H*W).
    x_c_hw = x_nchw.reshape(N, Cin, HW).astype(jnp.float32)
    x_c_hw = jnp.pad(x_c_hw, ((0, 0), (0, cin_p - Cin), (0, 0)))

    def fold_bn(gamma, beta, mean, var):
        g, bt, m, v = (np.asarray(a, np.float32) for a in (gamma, beta, mean, var))
        s = g / np.sqrt(v + EPS)
        return s, bt - m * s

    map_s, map_b = fold_bn(*P['map_bn'])      # (4*hidden,)
    gp_s, gp_b = fold_bn(*P['gp_bn'])         # (hidden,)
    red_s, red_b = fold_bn(*P['red_bn'])      # (out_ch,)

    # Fused map_convs weight in transposed orientation: (4*hidden, T*cin_p).
    # Column block t holds the input-channel weights of tap offset taps[t];
    # rows are ordered [1x1 | d=12 | d=24 | d=36]; map_bn scale folded in.
    wcat = np.zeros((hid4, T * cin_p), np.float32)
    t0 = taps.index((0, 0))
    wcat[0:hidden, t0 * cin_p: t0 * cin_p + Cin] = np.asarray(P['w_map0'])[:, :, 0, 0]
    for bi, d in enumerate(DILATIONS, start=1):
        wd = np.asarray(P[f'w_map{bi}'])                          # (hid, Cin, 3, 3)
        r0 = bi * hidden
        for t, (oy, ox) in enumerate(taps):
            if oy in (-d, 0, d) and ox in (-d, 0, d):
                wcat[r0:r0 + hidden, t * cin_p: t * cin_p + Cin] = \
                    wd[:, :, oy // d + 1, ox // d + 1]
    wcat *= map_s.reshape(-1, 1)

    # 1x1 convs, transposed, BN scales folded, rows zero-padded to sublane
    # multiples (padded rows stay exactly zero through the whole pipeline).
    wred = np.zeros((cout_p, hid4), np.float32)
    wred[:out_ch] = np.asarray(P['w_red'])[:, :, 0, 0] * red_s.reshape(-1, 1)

    wgp = np.zeros((cin_p, hidden), np.float32)
    wgp[:Cin] = np.asarray(P['w_gp'])[:, :, 0, 0].T * gp_s.reshape(1, -1)

    wpred = np.zeros((cout_p, hidden), np.float32)
    wpred[:out_ch] = np.asarray(P['w_pred'])[:, :, 0, 0] * red_s.reshape(-1, 1)

    # last_conv 3x3 as (cout_p, 9*cout_p); column block j = offset LAST_OFFS[j].
    wlast = np.zeros((cout_p, 9 * cout_p), np.float32)
    wl = np.asarray(P['w_last'])                                   # (out, out, 3, 3)
    for j, (dy, dx) in enumerate(LAST_OFFS):
        wlast[:out_ch, j * cout_p: j * cout_p + out_ch] = wl[:, :, dy + 1, dx + 1]

    # BN shifts as broadcastable columns / rows.
    mapb = map_b.reshape(-1, 1)                                    # (4*hid, 1)
    gpb = gp_b.reshape(1, -1)                                      # (1, hid)
    redb = np.zeros((cout_p, 1), np.float32)
    redb[:out_ch, 0] = red_b

    # Tap-validity mask expanded to the patches layout (T*cin_p, HW).
    yy, xx = np.meshgrid(np.arange(H), np.arange(W), indexing='ij')
    m1 = np.zeros((T * cin_p, HW), np.float32)
    for t, (oy, ox) in enumerate(taps):
        valid = ((yy + oy >= 0) & (yy + oy < H) &
                 (xx + ox >= 0) & (xx + ox < W)).astype(np.float32)
        m1[t * cin_p:(t + 1) * cin_p, :] = valid.reshape(1, HW)

    cdt = compute_dtype
    wcat_j = jnp.asarray(wcat, cdt)
    wred_j = jnp.asarray(wred, cdt)
    wlast_j = jnp.asarray(wlast, cdt)
    wgp_j = jnp.asarray(wgp, jnp.float32)
    wpred_j = jnp.asarray(wpred, jnp.float32)
    mapb_j = jnp.asarray(mapb, jnp.float32)
    gpb_j = jnp.asarray(gpb, jnp.float32)
    redb_j = jnp.asarray(redb, jnp.float32)
    m1_j = jnp.asarray(m1, jnp.float32)

    kernel = make_aspp_kernel(H, W, taps, nb)

    def const(shape):
        return pl.BlockSpec(shape, lambda g, _s=len(shape): (0,) * _s)

    grid_spec = pltpu.PrefetchScalarGridSpec(
        num_scalar_prefetch=0,
        grid=(grid_n,),
        in_specs=[
            pl.BlockSpec((nb, cin_p, HW), lambda g: (g, 0, 0)),    # x (per step)
            const((hid4, T * cin_p)),                              # fused map weight
            const((hid4, 1)),                                      # map_bn bias
            const((cout_p, hid4)),                                 # red weight
            const((cin_p, hidden)),                                # gp weight
            const((1, hidden)),                                    # gp_bn bias
            const((cout_p, hidden)),                               # pool_red weight
            const((cout_p, 1)),                                    # red_bn bias
            const((cout_p, 9 * cout_p)),                           # last_conv weight
            const((T * cin_p, HW)),                                # tap mask
        ],
        out_specs=pl.BlockSpec((nb, cout_p, HW), lambda g: (g, 0, 0)),
    )

    out_full = pl.pallas_call(
        kernel,
        out_shape=jax.ShapeDtypeStruct((N, cout_p, HW), jnp.float32),
        grid_spec=grid_spec,
        compiler_params=pltpu.CompilerParams(
            dimension_semantics=("parallel",)),    # megacore split on v7x
    )(x_c_hw, wcat_j, mapb_j, wred_j, wgp_j, gpb_j, wpred_j, redb_j,
      wlast_j, m1_j)

    # (N, cout_p, HW) -> valid 3x3 interior, already NCHW-ordered.
    out = out_full.reshape(N, cout_p, H, W)[:, :out_ch, 1:H - 1, 1:W - 1]
    return out


# ----------------------------------------------------------------------------
# Pure-JAX reference (mirrors the PyTorch forward, eval-mode BN).
# ----------------------------------------------------------------------------
def aspp_ref(x, P):
    def conv2d(x, w, dilation=1, padding=0):
        return jax.lax.conv_general_dilated(
            x, w, (1, 1), [(padding, padding), (padding, padding)],
            rhs_dilation=(dilation, dilation),
            dimension_numbers=('NCHW', 'OIHW', 'NCHW'))

    def bn(x, gamma, beta, mean, var):
        s = gamma / jnp.sqrt(var + EPS)
        return x * s[None, :, None, None] + (beta - mean * s)[None, :, None, None]

    lre = lambda t: jnp.where(t > 0, t, LEAK * t)

    outs = [conv2d(x, P['w_map0'])]
    for i, d in enumerate(DILATIONS, start=1):
        outs.append(conv2d(x, P[f'w_map{i}'], dilation=d, padding=d))
    out = jnp.concatenate(outs, axis=1)
    out = lre(bn(out, *P['map_bn']))
    out = conv2d(out, P['w_red'])

    pool = x.reshape(x.shape[0], x.shape[1], -1).mean(axis=-1)[:, :, None, None]
    pool = conv2d(pool, P['w_gp'])
    pool = lre(bn(pool, *P['gp_bn']))
    pool = conv2d(pool, P['w_pred'])
    pool = jnp.tile(pool, (1, 1, x.shape[2], x.shape[3]))

    out = out + pool
    out = lre(bn(out, *P['red_bn']))
    out = conv2d(out, P['w_last'])
    return out


# ----------------------------------------------------------------------------
def make_params(key, in_ch, hidden, out_ch):
    ks = jax.random.split(key, 24)
    it = iter(ks)
    w = lambda shape: 0.1 * jax.random.normal(next(it), shape, jnp.float32)

    def bn_params(c):
        gamma = 1.0 + 0.1 * jax.random.normal(next(it), (c,), jnp.float32)
        beta = 0.1 * jax.random.normal(next(it), (c,), jnp.float32)
        mean = 0.1 * jax.random.normal(next(it), (c,), jnp.float32)
        var = 1.0 + 0.1 * jnp.abs(jax.random.normal(next(it), (c,), jnp.float32))
        return (gamma, beta, mean, var)

    P = {
        'w_map0': w((hidden, in_ch, 1, 1)),
        'w_map1': w((hidden, in_ch, 3, 3)),
        'w_map2': w((hidden, in_ch, 3, 3)),
        'w_map3': w((hidden, in_ch, 3, 3)),
        'map_bn': bn_params(hidden * 4),
        'w_gp': w((hidden, in_ch, 1, 1)),
        'gp_bn': bn_params(hidden),
        'w_red': w((out_ch, hidden * 4, 1, 1)),
        'w_pred': w((out_ch, hidden, 1, 1)),
        'red_bn': bn_params(out_ch),
        'w_last': w((out_ch, out_ch, 3, 3)),
    }
    return P


if __name__ == "__main__":
    N, Cin, H, W = 2, 4, 16, 16
    hidden, out_ch = 32, 8

    key = jax.random.PRNGKey(0)
    kx, kp = jax.random.split(key)
    x = jax.random.normal(kx, (N, Cin, H, W), jnp.float32)
    P = make_params(kp, Cin, hidden, out_ch)

    # f32 matmul operands: tight check.
    out = jax.block_until_ready(aspp_pallas(x, P, hidden, out_ch))
    ref = jax.block_until_ready(aspp_ref(x, P))
    assert out.shape == ref.shape == (N, out_ch, H - 2, W - 2), (out.shape, ref.shape)
    np.testing.assert_allclose(np.asarray(out), np.asarray(ref), rtol=1e-4, atol=1e-4)

    # bf16 matmul operands (MXU-native on v5e/v6e/v7x), f32 accumulation:
    # exercised with a correspondingly looser tolerance.
    out_bf16 = jax.block_until_ready(
        aspp_pallas(x, P, hidden, out_ch, compute_dtype=jnp.bfloat16))
    np.testing.assert_allclose(np.asarray(out_bf16), np.asarray(ref),
                               rtol=1e-1, atol=1e-1)

    print("KERNEL_OK")
</pallas_src>

<mosaic_0001>
module attributes {stable_mosaic.version = 11 : i64} {
  func.func @kernel(%arg0: i32, %arg1: memref<1x8x256xf32, #tpu.memory_space<vmem>>, %arg2: memref<128x72xf32, #tpu.memory_space<vmem>>, %arg3: memref<128x1xf32, #tpu.memory_space<vmem>>, %arg4: memref<8x128xf32, #tpu.memory_space<vmem>>, %arg5: memref<8x32xf32, #tpu.memory_space<vmem>>, %arg6: memref<1x32xf32, #tpu.memory_space<vmem>>, %arg7: memref<8x32xf32, #tpu.memory_space<vmem>>, %arg8: memref<8x1xf32, #tpu.memory_space<vmem>>, %arg9: memref<8x72xf32, #tpu.memory_space<vmem>>, %arg10: memref<72x256xf32, #tpu.memory_space<vmem>>, %arg11: memref<1x8x256xf32, #tpu.memory_space<vmem>>) attributes {dimension_semantics = [#tpu.dimension_semantics<parallel>], iteration_bounds = array<i64: 2>, scalar_prefetch = 0 : i64, scratch_operands = 0 : i64, tpu.core_type = #tpu.core_type<tc>, window_params = [{transform_indices = @transform_0, window_bounds = array<i64: 1, 8, 256>}, {pipeline_mode = #tpu.pipeline_mode<synchronous>, transform_indices = @transform_1, window_bounds = array<i64: 128, 72>}, {pipeline_mode = #tpu.pipeline_mode<synchronous>, transform_indices = @transform_2, window_bounds = array<i64: 128, 1>}, {pipeline_mode = #tpu.pipeline_mode<synchronous>, transform_indices = @transform_3, window_bounds = array<i64: 8, 128>}, {pipeline_mode = #tpu.pipeline_mode<synchronous>, transform_indices = @transform_4, window_bounds = array<i64: 8, 32>}, {pipeline_mode = #tpu.pipeline_mode<synchronous>, transform_indices = @transform_5, window_bounds = array<i64: 1, 32>}, {pipeline_mode = #tpu.pipeline_mode<synchronous>, transform_indices = @transform_6, window_bounds = array<i64: 8, 32>}, {pipeline_mode = #tpu.pipeline_mode<synchronous>, transform_indices = @transform_7, window_bounds = array<i64: 8, 1>}, {pipeline_mode = #tpu.pipeline_mode<synchronous>, transform_indices = @transform_8, window_bounds = array<i64: 8, 72>}, {pipeline_mode = #tpu.pipeline_mode<synchronous>, transform_indices = @transform_9, window_bounds = array<i64: 72, 256>}, {transform_indices = @transform_10, window_bounds = array<i64: 1, 8, 256>}]} {
    %c0 = arith.constant 0 : index
    %c0_0 = arith.constant 0 : index
    %c0_1 = arith.constant 0 : index
    %0 = vector.load %arg1[%c0, %c0_0, %c0_1] : memref<1x8x256xf32, #tpu.memory_space<vmem>>, vector<1x8x256xf32>
    %1 = vector.shape_cast %0 : vector<1x8x256xf32> to vector<8x256xf32>
    %c204_i32 = arith.constant 204 : i32
    %2 = tpu.dynamic_rotate %1 by %c204_i32 dim 1 : vector<8x256xf32>, i32 -> vector<8x256xf32>
    %c192_i32 = arith.constant 192 : i32
    %3 = tpu.dynamic_rotate %1 by %c192_i32 dim 1 : vector<8x256xf32>, i32 -> vector<8x256xf32>
    %c180_i32 = arith.constant 180 : i32
    %4 = tpu.dynamic_rotate %1 by %c180_i32 dim 1 : vector<8x256xf32>, i32 -> vector<8x256xf32>
    %c12_i32 = arith.constant 12 : i32
    %5 = tpu.dynamic_rotate %1 by %c12_i32 dim 1 : vector<8x256xf32>, i32 -> vector<8x256xf32>
    %c244_i32 = arith.constant 244 : i32
    %6 = tpu.dynamic_rotate %1 by %c244_i32 dim 1 : vector<8x256xf32>, i32 -> vector<8x256xf32>
    %c76_i32 = arith.constant 76 : i32
    %7 = tpu.dynamic_rotate %1 by %c76_i32 dim 1 : vector<8x256xf32>, i32 -> vector<8x256xf32>
    %c64_i32 = arith.constant 64 : i32
    %8 = tpu.dynamic_rotate %1 by %c64_i32 dim 1 : vector<8x256xf32>, i32 -> vector<8x256xf32>
    %c52_i32 = arith.constant 52 : i32
    %9 = tpu.dynamic_rotate %1 by %c52_i32 dim 1 : vector<8x256xf32>, i32 -> vector<8x256xf32>
    %10 = tpu.concatenate %2, %3, %4, %5, %1, %6, %7, %8, %9 in 0 : vector<8x256xf32>, vector<8x256xf32>, vector<8x256xf32>, vector<8x256xf32>, vector<8x256xf32>, vector<8x256xf32>, vector<8x256xf32>, vector<8x256xf32>, vector<8x256xf32> -> vector<72x256xf32>
    %c0_2 = arith.constant 0 : index
    %c0_3 = arith.constant 0 : index
    %11 = vector.load %arg10[%c0_2, %c0_3] : memref<72x256xf32, #tpu.memory_space<vmem>>, vector<72x256xf32>
    %12 = arith.mulf %10, %11 : vector<72x256xf32>
    %c0_4 = arith.constant 0 : index
    %c0_5 = arith.constant 0 : index
    %13 = vector.load %arg2[%c0_4, %c0_5] : memref<128x72xf32, #tpu.memory_space<vmem>>, vector<128x72xf32>
    %cst = arith.constant dense<0.000000e+00> : vector<128x256xf32>
    %14 = tpu.matmul %13, %12, %cst {dimension_numbers = #tpu.dot_dimension_numbers<[1], [0], [0], [1], [0, 0, 1, 1], [], []>} : vector<128x72xf32>, vector<72x256xf32>, vector<128x256xf32> -> vector<128x256xf32>
    %c0_6 = arith.constant 0 : index
    %c0_7 = arith.constant 0 : index
    %15 = vector.load %arg3[%c0_6, %c0_7] : memref<128x1xf32, #tpu.memory_space<vmem>>, vector<128x1xf32>
    %16 = vector.broadcast %15 : vector<128x1xf32> to vector<128x256xf32>
    %17 = arith.addf %14, %16 : vector<128x256xf32>
    %cst_8 = arith.constant 0.000000e+00 : f32
    %18 = vector.broadcast %cst_8 : f32 to vector<128x256xf32>
    %19 = arith.cmpf ogt, %17, %18 : vector<128x256xf32>
    %cst_9 = arith.constant 0.00999999977 : f32
    %20 = vector.broadcast %cst_9 : f32 to vector<128x256xf32>
    %21 = arith.mulf %20, %17 : vector<128x256xf32>
    %22 = arith.select %19, %17, %21 : vector<128x256xi1>, vector<128x256xf32>
    %c0_10 = arith.constant 0 : index
    %c0_11 = arith.constant 0 : index
    %23 = vector.load %arg4[%c0_10, %c0_11] : memref<8x128xf32, #tpu.memory_space<vmem>>, vector<8x128xf32>
    %cst_12 = arith.constant dense<0.000000e+00> : vector<8x256xf32>
    %24 = tpu.matmul %23, %22, %cst_12 {dimension_numbers = #tpu.dot_dimension_numbers<[1], [0], [0], [1], [0, 0, 1, 1], [], []>} : vector<8x128xf32>, vector<128x256xf32>, vector<8x256xf32> -> vector<8x256xf32>
    %cst_13 = arith.constant dense<0.000000e+00> : vector<8xf32>
    %25 = vector.multi_reduction <add>, %1, %cst_13 [1] : vector<8x256xf32> to vector<8xf32>
    %26 = vector.shape_cast %25 : vector<8xf32> to vector<8x1xf32>
    %cst_14 = arith.constant 2.560000e+02 : f32
    %27 = vector.broadcast %cst_14 : f32 to vector<8x1xf32>
    %28 = arith.divf %26, %27 : vector<8x1xf32>
    %c0_15 = arith.constant 0 : index
    %c0_16 = arith.constant 0 : index
    %29 = vector.load %arg5[%c0_15, %c0_16] : memref<8x32xf32, #tpu.memory_space<vmem>>, vector<8x32xf32>
    %30 = vector.broadcast %28 : vector<8x1xf32> to vector<8x32xf32>
    %31 = arith.mulf %29, %30 : vector<8x32xf32>
    %cst_17 = arith.constant dense<0.000000e+00> : vector<32xf32>
    %32 = vector.multi_reduction <add>, %31, %cst_17 [0] : vector<8x32xf32> to vector<32xf32>
    %33 = vector.shape_cast %32 : vector<32xf32> to vector<1x32xf32>
    %c0_18 = arith.constant 0 : index
    %c0_19 = arith.constant 0 : index
    %34 = vector.load %arg6[%c0_18, %c0_19] : memref<1x32xf32, #tpu.memory_space<vmem>>, vector<1x32xf32>
    %35 = arith.addf %33, %34 : vector<1x32xf32>
    %cst_20 = arith.constant 0.000000e+00 : f32
    %36 = vector.broadcast %cst_20 : f32 to vector<1x32xf32>
    %37 = arith.cmpf ogt, %35, %36 : vector<1x32xf32>
    %cst_21 = arith.constant 0.00999999977 : f32
    %38 = vector.broadcast %cst_21 : f32 to vector<1x32xf32>
    %39 = arith.mulf %38, %35 : vector<1x32xf32>
    %40 = arith.select %37, %35, %39 : vector<1x32xi1>, vector<1x32xf32>
    %c0_22 = arith.constant 0 : index
    %c0_23 = arith.constant 0 : index
    %41 = vector.load %arg7[%c0_22, %c0_23] : memref<8x32xf32, #tpu.memory_space<vmem>>, vector<8x32xf32>
    %42 = vector.broadcast %40 : vector<1x32xf32> to vector<8x32xf32>
    %43 = arith.mulf %41, %42 : vector<8x32xf32>
    %cst_24 = arith.constant dense<0.000000e+00> : vector<8xf32>
    %44 = vector.multi_reduction <add>, %43, %cst_24 [1] : vector<8x32xf32> to vector<8xf32>
    %45 = vector.shape_cast %44 : vector<8xf32> to vector<8x1xf32>
    %46 = vector.broadcast %45 : vector<8x1xf32> to vector<8x256xf32>
    %47 = arith.addf %24, %46 : vector<8x256xf32>
    %c0_25 = arith.constant 0 : index
    %c0_26 = arith.constant 0 : index
    %48 = vector.load %arg8[%c0_25, %c0_26] : memref<8x1xf32, #tpu.memory_space<vmem>>, vector<8x1xf32>
    %49 = vector.broadcast %48 : vector<8x1xf32> to vector<8x256xf32>
    %50 = arith.addf %47, %49 : vector<8x256xf32>
    %cst_27 = arith.constant 0.000000e+00 : f32
    %51 = vector.broadcast %cst_27 : f32 to vector<8x256xf32>
    %52 = arith.cmpf ogt, %50, %51 : vector<8x256xf32>
    %cst_28 = arith.constant 0.00999999977 : f32
    %53 = vector.broadcast %cst_28 : f32 to vector<8x256xf32>
    %54 = arith.mulf %53, %50 : vector<8x256xf32>
    %55 = arith.select %52, %50, %54 : vector<8x256xi1>, vector<8x256xf32>
    %c17_i32 = arith.constant 17 : i32
    %56 = tpu.dynamic_rotate %55 by %c17_i32 dim 1 : vector<8x256xf32>, i32 -> vector<8x256xf32>
    %c16_i32 = arith.constant 16 : i32
    %57 = tpu.dynamic_rotate %55 by %c16_i32 dim 1 : vector<8x256xf32>, i32 -> vector<8x256xf32>
    %c15_i32 = arith.constant 15 : i32
    %58 = tpu.dynamic_rotate %55 by %c15_i32 dim 1 : vector<8x256xf32>, i32 -> vector<8x256xf32>
    %c1_i32 = arith.constant 1 : i32
    %59 = tpu.dynamic_rotate %55 by %c1_i32 dim 1 : vector<8x256xf32>, i32 -> vector<8x256xf32>
    %c255_i32 = arith.constant 255 : i32
    %60 = tpu.dynamic_rotate %55 by %c255_i32 dim 1 : vector<8x256xf32>, i32 -> vector<8x256xf32>
    %c241_i32 = arith.constant 241 : i32
    %61 = tpu.dynamic_rotate %55 by %c241_i32 dim 1 : vector<8x256xf32>, i32 -> vector<8x256xf32>
    %c240_i32 = arith.constant 240 : i32
    %62 = tpu.dynamic_rotate %55 by %c240_i32 dim 1 : vector<8x256xf32>, i32 -> vector<8x256xf32>
    %c239_i32 = arith.constant 239 : i32
    %63 = tpu.dynamic_rotate %55 by %c239_i32 dim 1 : vector<8x256xf32>, i32 -> vector<8x256xf32>
    %64 = tpu.concatenate %56, %57, %58, %59, %55, %60, %61, %62, %63 in 0 : vector<8x256xf32>, vector<8x256xf32>, vector<8x256xf32>, vector<8x256xf32>, vector<8x256xf32>, vector<8x256xf32>, vector<8x256xf32>, vector<8x256xf32>, vector<8x256xf32> -> vector<72x256xf32>
    %c0_29 = arith.constant 0 : index
    %c0_30 = arith.constant 0 : index
    %65 = vector.load %arg9[%c0_29, %c0_30] : memref<8x72xf32, #tpu.memory_space<vmem>>, vector<8x72xf32>
    %cst_31 = arith.constant dense<0.000000e+00> : vector<8x256xf32>
    %66 = tpu.matmul %65, %64, %cst_31 {dimension_numbers = #tpu.dot_dimension_numbers<[1], [0], [0], [1], [0, 0, 1, 1], [], []>} : vector<8x72xf32>, vector<72x256xf32>, vector<8x256xf32> -> vector<8x256xf32>
    %c0_32 = arith.constant 0 : index
    %c0_33 = arith.constant 0 : index
    %c0_34 = arith.constant 0 : index
    %67 = vector.load %arg11[%c0_32, %c0_33, %c0_34] : memref<1x8x256xf32, #tpu.memory_space<vmem>>, vector<1x8x256xf32>
    %68 = vector.shape_cast %67 : vector<1x8x256xf32> to vector<8x256xf32>
    %69 = vector.shape_cast %66 : vector<8x256xf32> to vector<1x8x256xf32>
    tpu.vector_store %arg11[%c0_32, %c0_33, %c0_34], %69 {strides = array<i32>} : memref<1x8x256xf32, #tpu.memory_space<vmem>>, vector<1x8x256xf32>,
    return
  }
  func.func @transform_0(%arg0: i32) -> (i32, i32, i32) {
    %c0_i32 = arith.constant 0 : i32
    %c0_i32_0 = arith.constant 0 : i32
    %c0_i32_1 = arith.constant 0 : i32
    return %arg0, %c0_i32, %c0_i32_0 : i32, i32, i32
  }
  func.func @transform_1(%arg0: i32) -> (i32, i32) {
    %c0_i32 = arith.constant 0 : i32
    %c0_i32_0 = arith.constant 0 : i32
    %c0_i32_1 = arith.constant 0 : i32
    return %c0_i32, %c0_i32_0 : i32, i32
  }
  func.func @transform_2(%arg0: i32) -> (i32, i32) {
    %c0_i32 = arith.constant 0 : i32
    %c0_i32_0 = arith.constant 0 : i32
    %c0_i32_1 = arith.constant 0 : i32
    return %c0_i32, %c0_i32_0 : i32, i32
  }
  func.func @transform_3(%arg0: i32) -> (i32, i32) {
    %c0_i32 = arith.constant 0 : i32
    %c0_i32_0 = arith.constant 0 : i32
    %c0_i32_1 = arith.constant 0 : i32
    return %c0_i32, %c0_i32_0 : i32, i32
  }
  func.func @transform_4(%arg0: i32) -> (i32, i32) {
    %c0_i32 = arith.constant 0 : i32
    %c0_i32_0 = arith.constant 0 : i32
    %c0_i32_1 = arith.constant 0 : i32
    return %c0_i32, %c0_i32_0 : i32, i32
  }
  func.func @transform_5(%arg0: i32) -> (i32, i32) {
    %c0_i32 = arith.constant 0 : i32
    %c0_i32_0 = arith.constant 0 : i32
    %c0_i32_1 = arith.constant 0 : i32
    return %c0_i32, %c0_i32_0 : i32, i32
  }
  func.func @transform_6(%arg0: i32) -> (i32, i32) {
    %c0_i32 = arith.constant 0 : i32
    %c0_i32_0 = arith.constant 0 : i32
    %c0_i32_1 = arith.constant 0 : i32
    return %c0_i32, %c0_i32_0 : i32, i32
  }
  func.func @transform_7(%arg0: i32) -> (i32, i32) {
    %c0_i32 = arith.constant 0 : i32
    %c0_i32_0 = arith.constant 0 : i32
    %c0_i32_1 = arith.constant 0 : i32
    return %c0_i32, %c0_i32_0 : i32, i32
  }
  func.func @transform_8(%arg0: i32) -> (i32, i32) {
    %c0_i32 = arith.constant 0 : i32
    %c0_i32_0 = arith.constant 0 : i32
    %c0_i32_1 = arith.constant 0 : i32
    return %c0_i32, %c0_i32_0 : i32, i32
  }
  func.func @transform_9(%arg0: i32) -> (i32, i32) {
    %c0_i32 = arith.constant 0 : i32
    %c0_i32_0 = arith.constant 0 : i32
    %c0_i32_1 = arith.constant 0 : i32
    return %c0_i32, %c0_i32_0 : i32, i32
  }
  func.func @transform_10(%arg0: i32) -> (i32, i32, i32) {
    %c0_i32 = arith.constant 0 : i32
    %c0_i32_0 = arith.constant 0 : i32
    %c0_i32_1 = arith.constant 0 : i32
    return %arg0, %c0_i32, %c0_i32_0 : i32, i32, i32
  }
}

</mosaic_0001>

<bundles_post_ra>
// kernel: tpu_custom_call.1
= control target key start
LH: loop header
LB: loop body
LE: loop exit
PB: predicated region body
PF: predicated region fallthrough
CT: control target
= control target key end

     0   :  { %15 = vsyncpa [#allocation3], 0  ;;  %s1892_s0 = inlined_call_operand.vmem [shape: f32[2,8,256], index: 0, kind: input, shape index: {}]   ;;  %s1893_s1 = inlined_call_operand.vmem [shape: f32[128,72], index: 1, kind: input, shape index: {}]   ;;  %s1894_s2 = inlined_call_operand.vmem [shape: f32[128,1], index: 2, kind: input, shape index: {}]   ;;  %s1895_s3 = inlined_call_operand.vmem [shape: f32[8,128], index: 3, kind: input, shape index: {}]   ;;  %s1896_s4 = inlined_call_operand.vmem [shape: f32[8,32], index: 4, kind: input, shape index: {}]   ;;  %s1897_s5 = inlined_call_operand.vmem [shape: f32[1,32], index: 5, kind: input, shape index: {}]   ;;  %s1898_s6 = inlined_call_operand.vmem [shape: f32[8,32], index: 6, kind: input, shape index: {}]   ;;  %s1899_s7 = inlined_call_operand.vmem [shape: f32[8,1], index: 7, kind: input, shape index: {}]   ;;  %s1900_s8 = inlined_call_operand.vmem [shape: f32[8,72], index: 8, kind: input, shape index: {}]   ;;  %s1901_s9 = inlined_call_operand.vmem [shape: f32[72,256], index: 9, kind: input, shape index: {}]   ;;  %s1902_s10 = inlined_call_operand.hbm [shape: f32[2,8,256], index: 10, kind: output, shape index: {}]  }
   0x1   :  { %17 = vsyncpa [#allocation3 + $0x1], 0  ;;  %s1494_s13 = smov 0   ;;  %s1496_s14 = smov 0  }
   0x2   :  { %s1498_s15 = smov 0   ;;  %s1500_s16 = smov 0  }
   0x3 LB: > { %s1515_s17 = sadd.s32 4294967295, %s1421_s16   ;;  %s1173_s18 = sadd.s32 4294967294, %s1421_s16   ;;  %s1421_s16 = sphi %s1500_s16, %s1908_s16   ;;  %s1417_s15 = sphi %s1498_s15, %s1907_s15   ;;  %s1413_s14 = sphi %s1496_s14, %s1906_s14   ;;  %s1409_s13 = sphi %s1494_s13, %s1905_s13  }
   0x4   : > { %s1519_s19 = sadd.s32 1, %s1421_s16   ;;  %s245_s20 = sadd.s32 1, %s1417_s15 }
   0x5   : > { %s242_s21 = ssub.s32 %s1421_s16, %s1519_s19  ;;  %p255_p0 = scmp.ne.s32.totalorder %s1417_s15, %s1413_s14 }
   0x6   : > { %p243_p1 = scmp.eq.s32.totalorder %s242_s21, 0  ;;  %p256_p2 = scmp.eq.s32.totalorder %s1515_s17, 1 }
   0x7   : > { %p261_p3 = scmp.ne.s32.totalorder %s1413_s14, %s1409_s13  ;;  %p262_p4 = scmp.eq.s32.totalorder %s1173_s18, 1 }
   0x8   : > { %s1530_s22 = scalar_select %p243_p1, %s1417_s15, %s245_s20  }
   0x9   : > { %p1532_p5 = por %p256_p2, %p255_p0  ;;  %p1536_p6 = por %p262_p4, %p261_p3 }
   0xa   : > { %p1176_p7 = scmp.ge.s32.totalorder %s1421_s16, 1  ;;  %p315_p8 = scmp.lt.s32.totalorder %s1421_s16, 3 }
   0xc   : > { %p316_p9 = pnand %p1176_p7, %p315_p8 }
   0xd   : > { %p353_p10 = scmp.lt.s32.totalorder (!%p316_p9), %s1515_s17, 1  ;;  %v1423_v0 = vmov (!%p316_p9), 0   ;;  %s1424_s30 = smov (!%p316_p9), 64   ;;  %v450_v4 = vld [vmem:[%s1894_s2 + $0x8] sm:$0xff] (!%p316_p9)  ;;  %v1429_v5 = vmov (!%p316_p9), 0.0   ;;  %v451_v6 = vld [vmem:[%s1894_s2 + $0x10] sm:$0xff] (!%p316_p9)  ;;  %v364_v21 = vlaneseq (!%p316_p9) }
   0xe   : > { %319 = sbr.rel (%p316_p9) target bundleno = 1047 (0x417), region = 60  ;;  %1323 = vset.pattern.permute.xlu1 (!%p316_p9), %v1423_v0  ;;  %1322 = vset.pattern.permute.xlu0 (!%p316_p9), %v1423_v0  ;;  %s1425_s11 = smov (!%p316_p9), 76   ;;  %v453_v7 = vld [vmem:[%s1894_s2 + $0x20] sm:$0xff] (!%p316_p9)  ;;  %v455_v8 = vld [vmem:[%s1894_s2 + $0x30] sm:$0xff] (!%p316_p9)  ;;  %v452_v14 = vld [vmem:[%s1894_s2 + $0x18] sm:$0xff] (!%p316_p9)  ;;  %vm545_vm5 = vcmask (!%p316_p9), 588800  }
   0xf   : > { %s1426_s12 = smov (!%p316_p9), 52   ;;  %s1427_s18 = smov (!%p316_p9), 12   ;;  %658 = vmatprep.mubr.f32.mxu0 (!%p316_p9), %v1429_v5  ;;  %945 = vmatprep.mubr.f32.mxu1 (!%p316_p9), %v1429_v5  ;;  %v457_v9 = vld [vmem:[%s1894_s2 + $0x40] sm:$0xff] (!%p316_p9)  ;;  %v459_v10 = vld [vmem:[%s1894_s2 + $0x50] sm:$0xff] (!%p316_p9)  ;;  %v454_v15 = vld [vmem:[%s1894_s2 + $0x28] sm:$0xff] (!%p316_p9)  ;;  %v1614_v22 = vand.u32 (!%p316_p9), 127, %v364_v21 }
  0x10   : > { %s1428_s20 = smov (!%p316_p9), 116   ;;  %v461_v11 = vld [vmem:[%s1894_s2 + $0x60] sm:$0xff] (!%p316_p9)  ;;  %v463_v12 = vld [vmem:[%s1894_s2 + $0x70] sm:$0xff] (!%p316_p9)  ;;  %v456_v16 = vld [vmem:[%s1894_s2 + $0x38] sm:$0xff] (!%p316_p9)  ;;  %vm859_vm6 = vcmask (!%p316_p9), 261120   ;;  %s1430_s21 = smov (!%p316_p9), 15  }
  0x11   : > { %v449_v13 = vld [vmem:[%s1894_s2] sm:$0xff] (!%p316_p9)  ;;  %v458_v17 = vld [vmem:[%s1894_s2 + $0x48] sm:$0xff] (!%p316_p9)  ;;  %v460_v18 = vld [vmem:[%s1894_s2 + $0x58] sm:$0xff] (!%p316_p9)  ;;  %vm373_vm0 = vcmp.lt.s32.totalorder (!%p316_p9), %v1614_v22, 64  ;;  %vm366_vm1 = vcmp.lt.s32.totalorder (!%p316_p9), %v1614_v22, 76  ;;  %vm380_vm2 = vcmp.lt.s32.totalorder (!%p316_p9), %v1614_v22, 52 }
  0x12   : > { %v462_v19 = vld [vmem:[%s1894_s2 + $0x68] sm:$0xff] (!%p316_p9)  ;;  %v464_v20 = vld [vmem:[%s1894_s2 + $0x78] sm:$0xff] (!%p316_p9)  ;;  %v399_v25 = vld [vmem:[%s1901_s9 + $0x10] sm:$0xff] (!%p316_p9)  ;;  %vm387_vm3 = vcmp.lt.s32.totalorder (!%p316_p9), %v1614_v22, 12  ;;  %vm394_vm4 = vcmp.lt.s32.totalorder (!%p316_p9), %v1614_v22, 116  ;;  %s1433_s27 = smov (!%p316_p9), 16  }
  0x13   : > { %v397_v26 = vld [vmem:[%s1901_s9] sm:$0xff] (!%p316_p9)  ;;  %v398_v29 = vld [vmem:[%s1901_s9 + $0x8] sm:$0xff] (!%p316_p9)  ;;  %v400_v30 = vld [vmem:[%s1901_s9 + $0x18] sm:$0xff] (!%p316_p9)  ;;  %s1434_s28 = smov (!%p316_p9), 112  }
  0x14   : > { %v401_v43 = vld [vmem:[%s1901_s9 + $0x20] sm:$0xff] (!%p316_p9)  ;;  %v402_v44 = vld [vmem:[%s1901_s9 + $0x28] sm:$0xff] (!%p316_p9)  ;;  %v403_v47 = vld [vmem:[%s1901_s9 + $0x30] sm:$0xff] (!%p316_p9) }
  0x15   : > { %s354_s25 = scalar_select %p353_p10, %s1515_s17, 1  ;;  %v404_v48 = vld [vmem:[%s1901_s9 + $0x38] sm:$0xff]  ;;  %v406_v53 = vld [vmem:[%s1901_s9 + $0x48] sm:$0xff]  ;;  %v405_v54 = vld [vmem:[%s1901_s9 + $0x40] sm:$0xff] }
  0x16   : > { %v412_v55 = vld [vmem:[%s1901_s9 + $0x78] sm:$0xff]  ;;  %v410_v60 = vld [vmem:[%s1901_s9 + $0x68] sm:$0xff]  ;;  %v407_v61 = vld [vmem:[%s1901_s9 + $0x50] sm:$0xff] }
  0x17   : > { %s1202_s26 = sshll.u32 %s354_s25, 4  ;;  %v408_v62 = vld [vmem:[%s1901_s9 + $0x58] sm:$0xff]  ;;  %s1431_s25 = smov 17  }
  0x18   : > { %s357_s29 = scalar_lea.vmem %s1892_s0, %s1202_s26  ;;  %s1432_s26 = smov 127  }
  0x19   : > { %v1547_v1 = vld [vmem:[%s357_s29] sm:$0xff]  ;;  %v1549_v2 = vld [vmem:[%s357_s29 + $0x8] sm:$0xff]  ;;  %s1435_s29 = smov 1  }
  0x1a   : > { %369 = vrot.lane.b32.xlu1 %v1547_v1, %s1424_s30  ;;  %360 = vrot.lane.b32.xlu0 %v1547_v1, %s1425_s11  ;;  %v852_v3 = vadd.f32 %v1549_v2, %v1547_v1 }
  0x1e   : > { %371 = vrot.lane.b32.xlu1 %v1549_v2, %s1424_s30  ;;  %362 = vrot.lane.b32.xlu0 %v1549_v2, %s1425_s11  ;;  %s1436_s30 = smov 111   ;;  %s1437_s11 = smov 113  }
  0x22   : > { %378 = vrot.lane.b32.xlu1 %v1549_v2, %s1426_s12  ;;  %376 = vrot.lane.b32.xlu0 %v1547_v1, %s1426_s12 }
  0x26   : > { %385 = vrot.lane.b32.xlu1 %v1549_v2, %s1427_s18  ;;  %383 = vrot.lane.b32.xlu0 %v1547_v1, %s1427_s18 }
  0x2a   : > { %392 = vrot.lane.b32.xlu1 %v1549_v2, %s1428_s20  ;;  %390 = vrot.lane.b32.xlu0 %v1547_v1, %s1428_s20  ;;  %s350_s20 = sand.u32 1, %s1413_s14  }
  0x2e   : > { %472 = vperm.xlu1 %1323, %v450_v4   ;;  %467 = vperm.xlu0 %1322, %v449_v13  }
  0x32   : > { %477 = vperm.xlu1 %1323, %v451_v6   ;;  %482 = vperm.xlu0 %1322, %v452_v14   ;;  %v424_v6 = vmul.f32 %v406_v53, %v1549_v2 }
  0x36   : > { %487 = vperm.xlu1 %1323, %v453_v7   ;;  %492 = vperm.xlu0 %1322, %v454_v15   ;;  %v423_v7 = vmul.f32 %v405_v54, %v1547_v1 }
  0x3a   : > { %497 = vperm.xlu1 %1323, %v455_v8   ;;  %502 = vperm.xlu0 %1322, %v456_v16  }
  0x3e   : > { %507 = vperm.xlu1 %1323, %v457_v9   ;;  %512 = vperm.xlu0 %1322, %v458_v17  }
  0x42   : > { %517 = vperm.xlu1 %1323, %v459_v10   ;;  %522 = vperm.xlu0 %1322, %v460_v18   ;;  %v411_v10 = vld [vmem:[%s1901_s9 + $0x70] sm:$0xff] }
  0x46   : > { %527 = vperm.xlu1 %1323, %v461_v11   ;;  %532 = vperm.xlu0 %1322, %v462_v19   ;;  %v414_v19 = vld [vmem:[%s1901_s9 + $0x88] sm:$0xff] }
  0x4a   : > { %537 = vperm.xlu1 %1323, %v463_v12   ;;  %542 = vperm.xlu0 %1322, %v464_v20   ;;  %v409_v12 = vld [vmem:[%s1901_s9 + $0x60] sm:$0xff] }
  0x6e   : > { %853 = vadd.xlane.f32.xlu1 %v852_v3 }
  0x8c   : > { %v370_v23 = vpop.permute.xlu1 %369  ;;  %v361_v24 = vpop.permute.xlu0 %360 }
  0x90   : > { %v372_v27 = vpop.permute.xlu1 %371  ;;  %v363_v28 = vpop.permute.xlu0 %362 }
  0x91   : > { %v374_v31 = vsel %vm373_vm0, %v370_v23, %v372_v27  ;;  %v375_v32 = vsel %vm373_vm0, %v372_v27, %v370_v23  ;;  %v367_v33 = vsel %vm366_vm1, %v361_v24, %v363_v28  ;;  %v368_v34 = vsel %vm366_vm1, %v363_v28, %v361_v24  ;;  %v413_v23 = vld [vmem:[%s1901_s9 + $0x80] sm:$0xff]  ;;  %v434_v27 = vld [vmem:[%s1893_s1 + $0x8] sm:$0xff]  ;;  %v435_v28 = vld [vmem:[%s1893_s1 + $0x10] sm:$0xff] }
  0x92   : > { %v417_v35 = vmul.f32 %v399_v25, %v374_v31  ;;  %v415_v36 = vmul.f32 %v397_v26, %v367_v33  ;;  %v416_v37 = vmul.f32 %v398_v29, %v368_v34  ;;  %v418_v38 = vmul.f32 %v400_v30, %v375_v32  ;;  %v433_v26 = vld [vmem:[%s1893_s1] sm:$0xff]  ;;  %v436_v29 = vld [vmem:[%s1893_s1 + $0x18] sm:$0xff] }
  0x93   : > { %v430_v11 = vmul.f32 %v412_v55, %v374_v31  ;;  %v428_v13 = vmul.f32 %v410_v60, %v367_v33  ;;  %v429_v16 = vmul.f32 %v411_v10, %v375_v32  ;;  %v427_v17 = vmul.f32 %v409_v12, %v368_v34  ;;  %v437_v30 = vld [vmem:[%s1893_s1 + $0x20] sm:$0xff]  ;;  %v438_v31 = vld [vmem:[%s1893_s1 + $0x28] sm:$0xff]  ;;  %v439_v32 = vld [vmem:[%s1893_s1 + $0x30] sm:$0xff] }
  0x94   : > { %v379_v39 = vpop.permute.xlu1 %378  ;;  %v377_v40 = vpop.permute.xlu0 %376  ;;  %v1206_v41 = vpack.c.bf16 %v417_v35, %v415_v36  ;;  %v1204_v42 = vpack.c.bf16 %v418_v38, %v416_v37  ;;  %v440_v33 = vld [vmem:[%s1893_s1 + $0x38] sm:$0xff]  ;;  %v441_v34 = vld [vmem:[%s1893_s1 + $0x40] sm:$0xff]  ;;  %v442_v36 = vld [vmem:[%s1893_s1 + $0x48] sm:$0xff] }
  0x95   : > { %v381_v45 = vsel %vm380_vm2, %v377_v40, %v379_v39  ;;  %v382_v46 = vsel %vm380_vm2, %v379_v39, %v377_v40  ;;  %v1216_v18 = vpack.c.bf16 %v430_v11, %v428_v13  ;;  %v1218_v20 = vpack.c.bf16 %v429_v16, %v427_v17  ;;  %v443_v37 = vld [vmem:[%s1893_s1 + $0x50] sm:$0xff]  ;;  %v444_v39 = vld [vmem:[%s1893_s1 + $0x58] sm:$0xff]  ;;  %v867_v60 = vld [vmem:[%s1897_s5] sm:$0x1] }
  0x96   : > { %1205 = vmatprep.subr.bf16.mxu0 %v1204_v42  ;;  %v419_v56 = vmul.f32 %v401_v43, %v381_v45  ;;  %v420_v57 = vmul.f32 %v402_v44, %v382_v46  ;;  %v432_v24 = vmul.f32 %v414_v19, %v381_v45  ;;  %v431_v25 = vmul.f32 %v413_v23, %v382_v46  ;;  %v446_v42 = vld [vmem:[%s1893_s1 + $0x68] sm:$0xff]  ;;  %v447_v44 = vld [vmem:[%s1893_s1 + $0x70] sm:$0xff]  ;;  %v448_v46 = vld [vmem:[%s1893_s1 + $0x78] sm:$0xff] }
  0x97   : > { %1207 = vmatpush1.bf16.msra.mxu0 %v1206_v41  ;;  %v445_v41 = vld [vmem:[%s1893_s1 + $0x60] sm:$0xff] }
  0x98   : > { %v386_v49 = vpop.permute.xlu1 %385  ;;  %v384_v50 = vpop.permute.xlu0 %383  ;;  %v952_v10 = vld [vmem:[%s1899_s7] sm:$0xff] }
  0x99   : > { %v388_v51 = vsel %vm387_vm3, %v384_v50, %v386_v49  ;;  %v389_v52 = vsel %vm387_vm3, %v386_v49, %v384_v50  ;;  %v857_v50 = vld [vmem:[%s1896_s4] sm:$0xff] }
  0x9a   : > { %v421_v58 = vmul.f32 %v403_v47, %v389_v52  ;;  %v422_v59 = vmul.f32 %v404_v48, %v388_v51 }
  0x9c   : > { %v393_v63 = vpop.permute.xlu1 %392  ;;  %v391_v0 = vpop.permute.xlu0 %390  ;;  %v1208_v3 = vpack.c.bf16 %v422_v59, %v420_v57  ;;  %v1210_v4 = vpack.c.bf16 %v421_v58, %v419_v56 }
  0x9d   : > { %v395_v8 = vsel %vm394_vm4, %v391_v0, %v393_v63  ;;  %v396_v9 = vsel %vm394_vm4, %v393_v63, %v391_v0 }
  0x9e   : > { %v425_v14 = vmul.f32 %v407_v61, %v395_v8  ;;  %v426_v2 = vmul.f32 %v408_v62, %v396_v9  ;;  %1209 = vmatprep.subr.bf16.mxu0 %v1208_v3  ;;  %v874_v61 = vshrl.u32 %v364_v21, 7 }
  0x9f   : > { %1211 = vmatpush1.bf16.msra.mxu0 %v1210_v4 }
  0xa0   : > { %v1212_v1 = vpack.c.bf16 %v426_v2, %v424_v6  ;;  %v1214_v15 = vpack.c.bf16 %v425_v14, %v423_v7  ;;  %v875_v0 = vsub.s32 0, %v874_v61  ;;  %v872_v6 = vld [vmem:[%s1898_s6] sm:$0xff] }
  0xa2   : > { %1213 = vmatprep.subr.bf16.mxu0 %v1212_v1 }
  0xa3   : > { %1215 = vmatpush1.bf16.msra.mxu0 %v1214_v15 }
  0xa4   : > { %1217 = vmatprep.subr.bf16.mxu0 %v1216_v18 }
  0xa7   : > { %1219 = vmatpush1.bf16.msra.mxu0 %v1218_v20 }
  0xa8   : > { %610 = vmatprep.subr.mxu0 %v432_v24 }
  0xab   : > { %611 = vmatpush1.msra.mxu0 %v431_v25 }
  0xac   : > { %1180 = vmatmul.mubr.msk.f32.vlgmr.msra.gmra.mrb[0].mxu0 %vm545_vm5, %v433_v26 }
  0xad   : > { %664 = vmatprep.mubr.f32.mxu0 %v1429_v5  ;;  %v1724_v35 = vpop.permute.xlu1 %472  ;;  %v468_v21 = vpop.permute.xlu0 %467 }
  0xb0   : > { %1181 = vmatmul.mubr.msk.f32.gmra.mrb[2].mxu0 %vm545_vm5, %v434_v27 }
  0xb1   : > { %670 = vmatprep.mubr.f32.mxu0 %v1429_v5  ;;  %v1736_v38 = vpop.permute.xlu1 %477 }
  0xb4   : > { %1182 = vmatmul.mubr.msk.f32.gmra.mrb[4].mxu0 %vm545_vm5, %v435_v28 }
  0xb5   : > { %676 = vmatprep.mubr.f32.mxu0 %v1429_v5  ;;  %v1743_v40 = vpop.permute.xlu1 %487 }
  0xb8   : > { %1183 = vmatmul.mubr.msk.f32.gmra.mrb[6].mxu0 %vm545_vm5, %v436_v29 }
  0xb9   : > { %682 = vmatprep.mubr.f32.mxu0 %v1429_v5  ;;  %v1755_v43 = vpop.permute.xlu1 %497 }
  0xbc   : > { %1184 = vmatmul.mubr.msk.f32.gmra.mrb[8].mxu0 %vm545_vm5, %v437_v30 }
  0xbd   : > { %688 = vmatprep.mubr.f32.mxu0 %v1429_v5  ;;  %v1762_v45 = vpop.permute.xlu1 %507 }
  0xc0   : > { %1185 = vmatmul.mubr.msk.f32.gmra.mrb[10].mxu0 %vm545_vm5, %v438_v31 }
  0xc1   : > { %694 = vmatprep.mubr.f32.mxu0 %v1429_v5  ;;  %v1770_v47 = vpop.permute.xlu1 %517 }
  0xc4   : > { %1186 = vmatmul.mubr.msk.f32.gmra.mrb[12].mxu0 %vm545_vm5, %v439_v32 }
  0xc5   : > { %700 = vmatprep.mubr.f32.mxu0 %v1429_v5  ;;  %v1772_v48 = vpop.permute.xlu1 %527 }
  0xc8   : > { %1187 = vmatmul.mubr.msk.f32.gmra.mrb[14].mxu0 %vm545_vm5, %v440_v33  ;;  %v483_v33 = vpop.permute.xlu0 %482 }
  0xc9   : > { %706 = vmatprep.mubr.f32.mxu0 %v1429_v5  ;;  %v1774_v49 = vpop.permute.xlu1 %537 }
  0xcc   : > { %1188 = vmatmul.mubr.msk.f32.gmra.mrb[16].mxu0 %vm545_vm5, %v441_v34 }
  0xcd   : > { %712 = vmatprep.mubr.f32.mxu0 %v1429_v5 }
  0xd0   : > { %1189 = vmatmul.mubr.msk.f32.gmra.mrb[18].mxu0 %vm545_vm5, %v442_v36 }
  0xd1   : > { %718 = vmatprep.mubr.f32.mxu0 %v1429_v5 }
  0xd4   : > { %1190 = vmatmul.mubr.msk.f32.gmra.mrb[20].mxu0 %vm545_vm5, %v443_v37 }
  0xd5   : > { %724 = vmatprep.mubr.f32.mxu0 %v1429_v5 }
  0xd8   : > { %1191 = vmatmul.mubr.msk.f32.gmra.mrb[22].mxu0 %vm545_vm5, %v444_v39 }
  0xd9   : > { %730 = vmatprep.mubr.f32.mxu0 %v1429_v5 }
  0xdc   : > { %1192 = vmatmul.mubr.msk.f32.gmra.mrb[24].mxu0 %vm545_vm5, %v445_v41 }
  0xdd   : > { %736 = vmatprep.mubr.f32.mxu0 %v1429_v5 }
  0xe0   : > { %1193 = vmatmul.mubr.msk.f32.gmra.mrb[26].mxu0 %vm545_vm5, %v446_v42 }
  0xe1   : > { %742 = vmatprep.mubr.f32.mxu0 %v1429_v5 }
  0xe4   : > { %1194 = vmatmul.mubr.msk.f32.gmra.mrb[28].mxu0 %vm545_vm5, %v447_v44 }
  0xe5   : > { %748 = vmatprep.mubr.f32.mxu0 %v1429_v5 }
  0xe8   : > { %1195 = vmatmul.mubr.msk.f32.gmra.mrb[30].mxu0 %vm545_vm5, %v448_v46 }
  0xfb   : > { %v854_v51 = vpop.xlane.xlu1 %853 }
  0xfc   : > { %v856_v52 = vmul.f32 0.00390625, %v854_v51 }
  0xfe   : > { %v858_v53 = vmul.f32 %v857_v50, %v856_v52 }
 0x100   : > { %v860_v54 = vsel %vm859_vm6, %v858_v53, 0.0 }
 0x101   : > { %v861_v55 = vrot.slane %v860_v54, 4 }
 0x103   : > { %v862_v56 = vadd.f32 %v861_v55, %v860_v54 }
 0x105   : > { %v863_v57 = vrot.slane %v862_v56, 2 }
 0x107   : > { %v864_v58 = vadd.f32 %v863_v57, %v862_v56 }
 0x109   : > { %v865_v59 = vrot.slane %v864_v58, 1 }
 0x10b   : > { %v866_v62 = vadd.f32 %v865_v59, %v864_v58  ;;  %v493_v58 = vpop.permute.xlu0 %492 }
 0x10d   : > { %v868_v63 = vadd.f32 %v867_v60, %v866_v62 }
 0x10f   : > { %vm869_vm7 = vcmp.gt.f32.partialorder %v868_v63, 0.0  ;;  %v870_v3 = vmul.f32 0.01, %v868_v63 }
 0x111   : > { %v871_v4 = vsel %vm869_vm7, %v868_v63, %v870_v3 }
 0x112   : > { %v876_v7 = vrot.slane %v871_v4, %v875_v0 }
 0x114   : > { %v877_v8 = vmul.f32 %v876_v7, %v872_v6 }
 0x116   : > { %v878_v9 = vsel %vm859_vm6, %v877_v8, 0.0 }
 0x117   : > { %879 = vadd.xlane.f32.xlu0 %v878_v9 }
 0x12d   : > { %955 = vperm.xlu0 %1322, %v952_v10  }
 0x17f   : > { %v660_v11 = vpop.f32.mrb[0].mxu0 }
 0x180   : > { %v661_v12 = vadd.f32 %v660_v11, %v468_v21  ;;  %v662_v13 = vpop.f32.mrb[1].mxu0 }
 0x181   : > { %v663_v14 = vadd.f32 %v662_v13, %v468_v21 }
 0x182   : > { %v787_v1 = vmul.f32 0.01, %v661_v12  ;;  %vm755_vm8 = vcmp.gt.f32.partialorder %v661_v12, 0.0 }
 0x183   : > { %v666_v2 = vpop.f32.mrb[2].mxu0  ;;  %v788_v17 = vmul.f32 0.01, %v663_v14  ;;  %vm756_vm9 = vcmp.gt.f32.partialorder %v663_v14, 0.0 }
 0x184   : > { %v667_v15 = vadd.f32 %v666_v2, %v1724_v35  ;;  %v668_v16 = vpop.f32.mrb[3].mxu0  ;;  %v819_v26 = vsel %vm755_vm8, %v661_v12, %v787_v1 }
 0x185   : > { %v669_v18 = vadd.f32 %v668_v16, %v1724_v35  ;;  %v820_v29 = vsel %vm756_vm9, %v663_v14, %v788_v17  ;;  %v503_v14 = vpop.permute.xlu0 %502 }
 0x186   : > { %v789_v19 = vmul.f32 0.01, %v667_v15  ;;  %vm757_vm10 = vcmp.gt.f32.partialorder %v667_v15, 0.0 }
 0x187   : > { %v790_v20 = vmul.f32 0.01, %v669_v18  ;;  %v672_v23 = vpop.f32.mrb[4].mxu0  ;;  %vm758_vm11 = vcmp.gt.f32.partialorder %v669_v18, 0.0 }
 0x188   : > { %v673_v24 = vadd.f32 %v672_v23, %v1736_v38  ;;  %v674_v25 = vpop.f32.mrb[5].mxu0  ;;  %v821_v27 = vsel %vm757_vm10, %v667_v15, %v789_v19 }
 0x189   : > { %v675_v28 = vadd.f32 %v674_v25, %v1736_v38  ;;  %v822_v30 = vsel %vm758_vm11, %v669_v18, %v790_v20  ;;  %v1222_v31 = vpack.c.bf16 %v821_v27, %v819_v26 }
 0x18a   : > { %v1220_v32 = vpack.c.bf16 %v822_v30, %v820_v29  ;;  %v791_v35 = vmul.f32 0.01, %v673_v24  ;;  %vm759_vm12 = vcmp.gt.f32.partialorder %v673_v24, 0.0 }
 0x18b   : > { %v678_v34 = vpop.f32.mrb[6].mxu0  ;;  %v792_v39 = vmul.f32 0.01, %v675_v28  ;;  %vm760_vm13 = vcmp.gt.f32.partialorder %v675_v28, 0.0 }
 0x18c   : > { %v679_v36 = vadd.f32 %v678_v34, %v483_v33  ;;  %v680_v37 = vpop.f32.mrb[7].mxu0  ;;  %1221 = vmatprep.subr.bf16.mxu1 %v1220_v32  ;;  %v823_v51 = vsel %vm759_vm12, %v673_v24, %v791_v35  ;;  %v513_v32 = vpop.permute.xlu0 %512 }
 0x18d   : > { %v681_v41 = vadd.f32 %v680_v37, %v483_v33  ;;  %1223 = vmatpush1.bf16.msra.mxu1 %v1222_v31  ;;  %v824_v54 = vsel %vm760_vm13, %v675_v28, %v792_v39 }
 0x18e   : > { %vm761_vm14 = vcmp.gt.f32.partialorder %v679_v36, 0.0  ;;  %v793_v42 = vmul.f32 0.01, %v679_v36 }
 0x18f   : > { %vm762_vm15 = vcmp.gt.f32.partialorder %v681_v41, 0.0  ;;  %v794_v44 = vmul.f32 0.01, %v681_v41  ;;  %v684_v38 = vpop.f32.mrb[8].mxu0 }
 0x190   : > { %v685_v46 = vadd.f32 %v684_v38, %v1743_v40  ;;  %v686_v50 = vpop.f32.mrb[9].mxu0  ;;  %v825_v52 = vsel %vm761_vm14, %v679_v36, %v793_v42 }
 0x191   : > { %v687_v53 = vadd.f32 %v686_v50, %v1743_v40  ;;  %v826_v55 = vsel %vm762_vm15, %v681_v41, %v794_v44  ;;  %v1226_v56 = vpack.c.bf16 %v825_v52, %v823_v51 }
 0x192   : > { %v1224_v57 = vpack.c.bf16 %v826_v55, %v824_v54  ;;  %v795_v60 = vmul.f32 0.01, %v685_v46  ;;  %vm763_vm0 = vcmp.gt.f32.partialorder %v685_v46, 0.0 }
 0x193   : > { %v690_v59 = vpop.f32.mrb[10].mxu0  ;;  %v796_v63 = vmul.f32 0.01, %v687_v53  ;;  %vm764_vm1 = vcmp.gt.f32.partialorder %v687_v53, 0.0 }
 0x194   : > { %v691_v61 = vadd.f32 %v690_v59, %v493_v58  ;;  %v692_v62 = vpop.f32.mrb[11].mxu0  ;;  %1225 = vmatprep.subr.bf16.mxu1 %v1224_v57  ;;  %v827_v8 = vsel %vm763_vm0, %v685_v46, %v795_v60 }
 0x195   : > { %v693_v0 = vadd.f32 %v692_v62, %v493_v58  ;;  %1227 = vmatpush1.bf16.msra.mxu1 %v1226_v56  ;;  %v828_v21 = vsel %vm764_vm1, %v687_v53, %v796_v63  ;;  %v523_v56 = vpop.permute.xlu0 %522 }
 0x196   : > { %vm765_vm2 = vcmp.gt.f32.partialorder %v691_v61, 0.0  ;;  %v797_v3 = vmul.f32 0.01, %v691_v61 }
 0x197   : > { %vm766_vm3 = vcmp.gt.f32.partialorder %v693_v0, 0.0  ;;  %v798_v4 = vmul.f32 0.01, %v693_v0  ;;  %v696_v40 = vpop.f32.mrb[12].mxu0 }
 0x198   : > { %v697_v6 = vadd.f32 %v696_v40, %v1755_v43  ;;  %v698_v7 = vpop.f32.mrb[13].mxu0  ;;  %v829_v9 = vsel %vm765_vm2, %v691_v61, %v797_v3 }
 0x199   : > { %v699_v10 = vadd.f32 %v698_v7, %v1755_v43  ;;  %v830_v11 = vsel %vm766_vm3, %v693_v0, %v798_v4  ;;  %v1230_v12 = vpack.c.bf16 %v829_v9, %v827_v8 }
 0x19a   : > { %v1228_v13 = vpack.c.bf16 %v830_v11, %v828_v21  ;;  %v799_v1 = vmul.f32 0.01, %v697_v6  ;;  %vm767_vm4 = vcmp.gt.f32.partialorder %v697_v6, 0.0  ;;  %v533_v11 = vpop.permute.xlu0 %532 }
 0x19b   : > { %v702_v2 = vpop.f32.mrb[14].mxu0  ;;  %v800_v17 = vmul.f32 0.01, %v699_v10  ;;  %vm768_vm6 = vcmp.gt.f32.partialorder %v699_v10, 0.0 }
 0x19c   : > { %v703_v15 = vadd.f32 %v702_v2, %v503_v14  ;;  %v704_v16 = vpop.f32.mrb[15].mxu0  ;;  %1229 = vmatprep.subr.bf16.mxu1 %v1228_v13  ;;  %v831_v25 = vsel %vm767_vm4, %v697_v6, %v799_v1 }
 0x19d   : > { %v705_v18 = vadd.f32 %v704_v16, %v503_v14  ;;  %1231 = vmatpush1.bf16.msra.mxu1 %v1230_v12  ;;  %v832_v28 = vsel %vm768_vm6, %v699_v10, %v800_v17 }
 0x19e   : > { %vm769_vm7 = vcmp.gt.f32.partialorder %v703_v15, 0.0  ;;  %v801_v19 = vmul.f32 0.01, %v703_v15 }
 0x19f   : > { %vm770_vm8 = vcmp.gt.f32.partialorder %v705_v18, 0.0  ;;  %v802_v20 = vmul.f32 0.01, %v705_v18  ;;  %v708_v43 = vpop.f32.mrb[16].mxu0 }
 0x1a0   : > { %v709_v23 = vadd.f32 %v708_v43, %v1762_v45  ;;  %v710_v24 = vpop.f32.mrb[17].mxu0  ;;  %v833_v26 = vsel %vm769_vm7, %v703_v15, %v801_v19 }
 0x1a1   : > { %v711_v27 = vadd.f32 %v710_v24, %v1762_v45  ;;  %v834_v29 = vsel %vm770_vm8, %v705_v18, %v802_v20  ;;  %v1234_v30 = vpack.c.bf16 %v833_v26, %v831_v25 }
 0x1a2   : > { %v1232_v31 = vpack.c.bf16 %v834_v29, %v832_v28  ;;  %v803_v34 = vmul.f32 0.01, %v709_v23  ;;  %vm771_vm9 = vcmp.gt.f32.partialorder %v709_v23, 0.0  ;;  %v543_v28 = vpop.permute.xlu0 %542 }
 0x1a3   : > { %v714_v33 = vpop.f32.mrb[18].mxu0  ;;  %v804_v37 = vmul.f32 0.01, %v711_v27  ;;  %vm772_vm10 = vcmp.gt.f32.partialorder %v711_v27, 0.0 }
 0x1a4   : > { %v715_v35 = vadd.f32 %v714_v33, %v513_v32  ;;  %v716_v36 = vpop.f32.mrb[19].mxu0  ;;  %1233 = vmatprep.subr.bf16.mxu1 %v1232_v31  ;;  %v835_v46 = vsel %vm771_vm9, %v709_v23, %v803_v34 }
 0x1a5   : > { %v717_v39 = vadd.f32 %v716_v36, %v513_v32  ;;  %1235 = vmatpush1.bf16.msra.mxu1 %v1234_v30  ;;  %v836_v52 = vsel %vm772_vm10, %v711_v27, %v804_v37 }
 0x1a6   : > { %vm773_vm11 = vcmp.gt.f32.partialorder %v715_v35, 0.0  ;;  %v805_v41 = vmul.f32 0.01, %v715_v35 }
 0x1a7   : > { %vm774_vm12 = vcmp.gt.f32.partialorder %v717_v39, 0.0  ;;  %v806_v42 = vmul.f32 0.01, %v717_v39  ;;  %v720_v45 = vpop.f32.mrb[20].mxu0 }
 0x1a8   : > { %v721_v44 = vadd.f32 %v720_v45, %v1770_v47  ;;  %v722_v38 = vpop.f32.mrb[21].mxu0  ;;  %v837_v50 = vsel %vm773_vm11, %v715_v35, %v805_v41 }
 0x1a9   : > { %v723_v51 = vadd.f32 %v722_v38, %v1770_v47  ;;  %v838_v53 = vsel %vm774_vm12, %v717_v39, %v806_v42  ;;  %v1238_v54 = vpack.c.bf16 %v837_v50, %v835_v46  ;;  %v880_v38 = vpop.xlane.xlu0 %879  ;;  %vm970_vm12 = vcmp.lt.s32.totalorder %v1614_v22, 17 }
 0x1aa   : > { %v1236_v55 = vpack.c.bf16 %v838_v53, %v836_v52  ;;  %v807_v58 = vmul.f32 0.01, %v721_v44  ;;  %vm775_vm13 = vcmp.gt.f32.partialorder %v721_v44, 0.0 }
 0x1ab   : > { %v726_v57 = vpop.f32.mrb[22].mxu0  ;;  %v808_v61 = vmul.f32 0.01, %v723_v51  ;;  %vm776_vm14 = vcmp.gt.f32.partialorder %v723_v51, 0.0 }
 0x1ac   : > { %v727_v59 = vadd.f32 %v726_v57, %v523_v56  ;;  %v728_v60 = vpop.f32.mrb[23].mxu0  ;;  %1237 = vmatprep.subr.bf16.mxu1 %v1236_v55  ;;  %v839_v40 = vsel %vm775_vm13, %v721_v44, %v807_v58  ;;  %v851_v44 = vld [vmem:[%s1895_s3] sm:$0xff]  ;;  %vm977_vm13 = vcmp.lt.s32.totalorder %v1614_v22, 16 }
 0x1ad   : > { %v729_v62 = vadd.f32 %v728_v60, %v523_v56  ;;  %1239 = vmatpush1.bf16.msra.mxu1 %v1238_v54  ;;  %v840_v8 = vsel %vm776_vm14, %v723_v51, %v808_v61  ;;  %v956_v52 = vpop.permute.xlu0 %955  ;;  %vm984_vm14 = vcmp.lt.s32.totalorder %v1614_v22, 15 }
 0x1ae   : > { %vm777_vm15 = vcmp.gt.f32.partialorder %v727_v59, 0.0  ;;  %v809_v63 = vmul.f32 0.01, %v727_v59 }
 0x1af   : > { %vm778_vm0 = vcmp.gt.f32.partialorder %v729_v62, 0.0  ;;  %v810_v0 = vmul.f32 0.01, %v729_v62  ;;  %v732_v47 = vpop.f32.mrb[24].mxu0 }
 0x1b0   : > { %v733_v3 = vadd.f32 %v732_v47, %v1772_v48  ;;  %v734_v4 = vpop.f32.mrb[25].mxu0  ;;  %v841_v6 = vsel %vm777_vm15, %v727_v59, %v809_v63  ;;  %vm998_vm15 = vcmp.lt.s32.totalorder %v1614_v22, 127 }
 0x1b1   : > { %v735_v7 = vadd.f32 %v734_v4, %v1772_v48  ;;  %v842_v9 = vsel %vm778_vm0, %v729_v62, %v810_v0  ;;  %v1242_v10 = vpack.c.bf16 %v841_v6, %v839_v40  ;;  %vm991_vm0 = vcmp.lt.s32.totalorder %v1614_v22, 1 }
 0x1b2   : > { %v1240_v21 = vpack.c.bf16 %v842_v9, %v840_v8  ;;  %v811_v13 = vmul.f32 0.01, %v733_v3  ;;  %vm779_vm1 = vcmp.gt.f32.partialorder %v733_v3, 0.0 }
 0x1b3   : > { %v738_v12 = vpop.f32.mrb[26].mxu0  ;;  %v812_v1 = vmul.f32 0.01, %v735_v7  ;;  %vm780_vm2 = vcmp.gt.f32.partialorder %v735_v7, 0.0 }
 0x1b4   : > { %v739_v14 = vadd.f32 %v738_v12, %v533_v11  ;;  %v740_v2 = vpop.f32.mrb[27].mxu0  ;;  %1241 = vmatprep.subr.bf16.mxu1 %v1240_v21  ;;  %v843_v20 = vsel %vm779_vm1, %v733_v3, %v811_v13  ;;  %vm1005_vm1 = vcmp.lt.s32.totalorder %v1614_v22, 113 }
 0x1b5   : > { %v741_v15 = vadd.f32 %v740_v2, %v533_v11  ;;  %1243 = vmatpush1.bf16.msra.mxu1 %v1242_v10  ;;  %v844_v24 = vsel %vm780_vm2, %v735_v7, %v812_v1  ;;  %vm1012_vm2 = vcmp.lt.s32.totalorder %v1614_v22, 112 }
 0x1b6   : > { %vm781_vm3 = vcmp.gt.f32.partialorder %v739_v14, 0.0  ;;  %v813_v16 = vmul.f32 0.01, %v739_v14 }
 0x1b7   : > { %vm782_vm4 = vcmp.gt.f32.partialorder %v741_v15, 0.0  ;;  %v814_v17 = vmul.f32 0.01, %v741_v15  ;;  %v744_v48 = vpop.f32.mrb[28].mxu0 }
 0x1b8   : > { %v745_v18 = vadd.f32 %v744_v48, %v1774_v49  ;;  %v746_v19 = vpop.f32.mrb[29].mxu0  ;;  %v845_v43 = vsel %vm781_vm3, %v739_v14, %v813_v16  ;;  %vm1019_vm3 = vcmp.lt.s32.totalorder %v1614_v22, 111 }
 0x1b9   : > { %v747_v23 = vadd.f32 %v746_v19, %v1774_v49  ;;  %v846_v25 = vsel %vm782_vm4, %v741_v15, %v814_v17  ;;  %v1246_v26 = vpack.c.bf16 %v845_v43, %v843_v20 }
 0x1ba   : > { %v1244_v27 = vpack.c.bf16 %v846_v25, %v844_v24  ;;  %v815_v30 = vmul.f32 0.01, %v745_v18  ;;  %vm783_vm6 = vcmp.gt.f32.partialorder %v745_v18, 0.0 }
 0x1bb   : > { %v750_v29 = vpop.f32.mrb[30].mxu0  ;;  %v816_v33 = vmul.f32 0.01, %v747_v23  ;;  %vm784_vm7 = vcmp.gt.f32.partialorder %v747_v23, 0.0 }
 0x1bc   : > { %v751_v31 = vadd.f32 %v750_v29, %v543_v28  ;;  %v752_v32 = vpop.f32.mrb[31].mxu0  ;;  %1245 = vmatprep.subr.bf16.mxu1 %v1244_v27  ;;  %v847_v49 = vsel %vm783_vm6, %v745_v18, %v815_v30 }
 0x1bd   : > { %v753_v34 = vadd.f32 %v752_v32, %v543_v28  ;;  %1247 = vmatpush1.bf16.msra.mxu1 %v1246_v26  ;;  %v848_v39 = vsel %vm784_vm7, %v747_v23, %v816_v33 }
 0x1be   : > { %vm785_vm8 = vcmp.gt.f32.partialorder %v751_v31, 0.0  ;;  %v817_v35 = vmul.f32 0.01, %v751_v31 }
 0x1bf   : > { %vm786_vm9 = vcmp.gt.f32.partialorder %v753_v34, 0.0  ;;  %v818_v36 = vmul.f32 0.01, %v753_v34 }
 0x1c0   : > { %v849_v37 = vsel %vm785_vm8, %v751_v31, %v817_v35 }
 0x1c1   : > { %v850_v41 = vsel %vm786_vm9, %v753_v34, %v818_v36  ;;  %v1250_v42 = vpack.c.bf16 %v849_v37, %v847_v49 }
 0x1c2   : > { %v1248_v45 = vpack.c.bf16 %v850_v41, %v848_v39  ;;  %v1022_v41 = vld [vmem:[%s1900_s8] sm:$0xff] }
 0x1c4   : > { %1249 = vmatprep.subr.bf16.mxu1 %v1248_v45 }
 0x1c5   : > { %1251 = vmatpush1.bf16.msra.mxu1 %v1250_v42 }
 0x1c8   : > { %946 = vmatmul.mubr.f32.vlgmr.msra.gmra.mrb[0].mxu1 %v851_v44 }
 0x1c9   : > { %1090 = vmatprep.mubr.f32.mxu1 %v1429_v5 }
 0x29b   : > { %v947_v46 = vpop.f32.mrb[0].mxu1 }
 0x29c   : > { %v948_v50 = vadd.f32 %v947_v46, %v880_v38  ;;  %v949_v51 = vpop.f32.mrb[1].mxu1 }
 0x29d   : > { %v950_v53 = vadd.f32 %v949_v51, %v880_v38 }
 0x29e   : > { %v958_v54 = vadd.f32 %v956_v52, %v948_v50 }
 0x29f   : > { %v959_v55 = vadd.f32 %v956_v52, %v950_v53 }
 0x2a0   : > { %vm960_vm10 = vcmp.gt.f32.partialorder %v958_v54, 0.0  ;;  %v962_v56 = vmul.f32 0.01, %v958_v54 }
 0x2a1   : > { %vm961_vm11 = vcmp.gt.f32.partialorder %v959_v55, 0.0  ;;  %v963_v57 = vmul.f32 0.01, %v959_v55 }
 0x2a2   : > { %v1811_v58 = vsel %vm960_vm10, %v958_v54, %v962_v56 }
 0x2a3   : > { %v1813_v59 = vsel %vm961_vm11, %v959_v55, %v963_v57 }
 0x2a4   : > { %v1334_v60 = vpack.i.bf16 %v1813_v59, %v1811_v58 }
 0x2a6   : > { %1335 = vrot.lane.b32.xlu0 %v1334_v60, %s1430_s21  ;;  %1325 = vrot.lane.b32.xlu1 %v1334_v60, %s1431_s25  ;;  %s1177_s21 = sshll.u32 %s350_s20, 4 }
 0x2a7   : > { %s352_s25 = scalar_lea.vmem [#allocation2], %s1177_s21 }
 0x2aa   : > { %1345 = vrot.lane.b32.xlu0 %v1334_v60, %s1432_s26  ;;  %1330 = vrot.lane.b32.xlu1 %v1334_v60, %s1433_s27  ;;  %s1114_s26 = sshll.u32 %s352_s25, 4  ;;  %s1203_s27 = sshll.u32 %s1515_s17, 8  ;;  %s1847_s26 = int_to_ptr.vmem [resolvable:$true] %s1114_s26 }
 0x2ab   : > { %s1359_s12 = scalar_lea.vmem %s1847_s26, 256  ;;  %s1438_s17 = smov [#allocation2]  }
 0x2ac   : > { %p1360_p11 = scmp.ne.s32.totalorder %s1847_s26, %s1359_s12  ;;  %s1363_s18 = sshll.u32 %s1438_s17, 4  ;;  %s1364_s18 = int_to_ptr.vmem [resolvable:$false] %s1363_s18 }
 0x2ad   : > { %s1365_s21 = scalar_lea.vmem %s1364_s18, 512  ;;  %p1366_p0 = scmp.lt.s32.totalorder %s1847_s26, %s1364_s18 }
 0x2ae   : > { %1355 = vrot.lane.b32.xlu0 %v1334_v60, %s1434_s28  ;;  %1340 = vrot.lane.b32.xlu1 %v1334_v60, %s1435_s29  ;;  %p1361_p12 = pnand %p1360_p11, %p1532_p5  ;;  %p1367_p1 = scmp.lt.s32.totalorder %s1365_s21, %s1359_s12 }
 0x2b0   : > { %p1362_p13 = pneg %p1361_p12  ;;  %p1368_p2 = por %p1367_p1, %p1366_p0 }
 0x2b2   : > { %1017 = vrot.lane.b32.xlu0 %v1813_v59, %s1436_s30  ;;  %1350 = vrot.lane.b32.xlu1 %v1334_v60, %s1437_s11  ;;  %s1100_s11 = scalar_lea.sflag [#allocation3], %s350_s20  ;;  %p1369_p3 = pnand %p1368_p2, %p1362_p13 }
 0x2b6   : > { %1015 = vrot.lane.b32.xlu1 %v1811_v58, %s1436_s30  ;;  %s1852_s30 = scalar_lea.hbm %s1902_s10, %s1203_s27 }
 0x318   : > { %v1336_v5 = vpop.permute.xlu0 %1335  ;;  %v1326_v61 = vpop.permute.xlu1 %1325 }
 0x319   : > { %v1328_v62 = vunpack.i.h.bf16 %v1326_v61  ;;  %v1327_v63 = vunpack.i.l.bf16 %v1326_v61  ;;  %v1338_v40 = vunpack.i.h.bf16 %v1336_v5  ;;  %v1337_v6 = vunpack.i.l.bf16 %v1336_v5 }
 0x31b   : > { %v972_v7 = vsel %vm970_vm12, %v1328_v62, %v1327_v63  ;;  %v971_v8 = vsel %vm970_vm12, %v1327_v63, %v1328_v62  ;;  %v986_v15 = vsel %vm984_vm14, %v1338_v40, %v1337_v6  ;;  %v985_v48 = vsel %vm984_vm14, %v1337_v6, %v1338_v40 }
 0x31c   : > { %v1346_v0 = vpop.permute.xlu0 %1345  ;;  %v1331_v47 = vpop.permute.xlu1 %1330 }
 0x31d   : > { %v1333_v3 = vunpack.i.h.bf16 %v1331_v47  ;;  %v1332_v4 = vunpack.i.l.bf16 %v1331_v47  ;;  %v1348_v9 = vunpack.i.h.bf16 %v1346_v0  ;;  %v1347_v10 = vunpack.i.l.bf16 %v1346_v0 }
 0x31f   : > { %v979_v21 = vsel %vm977_vm13, %v1333_v3, %v1332_v4  ;;  %v978_v11 = vsel %vm977_vm13, %v1332_v4, %v1333_v3  ;;  %v1000_v19 = vsel %vm998_vm15, %v1348_v9, %v1347_v10  ;;  %v999_v28 = vsel %vm998_vm15, %v1347_v10, %v1348_v9 }
 0x320   : > { %v1254_v12 = vpack.c.bf16 %v979_v21, %v972_v7  ;;  %v1341_v13 = vpop.permute.xlu1 %1340  ;;  %v1252_v14 = vpack.c.bf16 %v978_v11, %v971_v8  ;;  %v1356_v16 = vpop.permute.xlu0 %1355  ;;  %v1260_v29 = vpack.c.bf16 %v1000_v19, %v1813_v59  ;;  %v1262_v31 = vpack.c.bf16 %v999_v28, %v1811_v58 }
 0x321   : > { %v1343_v2 = vunpack.i.h.bf16 %v1341_v13  ;;  %v1342_v1 = vunpack.i.l.bf16 %v1341_v13  ;;  %v1358_v24 = vunpack.i.h.bf16 %v1356_v16  ;;  %v1357_v25 = vunpack.i.l.bf16 %v1356_v16 }
 0x322   : > { %1253 = vmatprep.subr.bf16.mxu1 %v1252_v14 }
 0x323   : > { %v993_v17 = vsel %vm991_vm0, %v1343_v2, %v1342_v1  ;;  %1255 = vmatpush1.bf16.msra.mxu1 %v1254_v12  ;;  %v992_v18 = vsel %vm991_vm0, %v1342_v1, %v1343_v2  ;;  %v1014_v32 = vsel %vm1012_vm2, %v1358_v24, %v1357_v25  ;;  %v1013_v35 = vsel %vm1012_vm2, %v1357_v25, %v1358_v24 }
 0x324   : > { %v1258_v20 = vpack.c.bf16 %v993_v17, %v986_v15  ;;  %v1351_v43 = vpop.permute.xlu1 %1350  ;;  %v1256_v23 = vpack.c.bf16 %v992_v18, %v985_v48  ;;  %v1018_v37 = vpop.permute.xlu0 %1017 }
 0x325   : > { %v1353_v26 = vunpack.i.h.bf16 %v1351_v43  ;;  %v1352_v27 = vunpack.i.l.bf16 %v1351_v43 }
 0x326   : > { %1257 = vmatprep.subr.bf16.mxu1 %v1256_v23 }
 0x327   : > { %1259 = vmatpush1.bf16.msra.mxu1 %v1258_v20  ;;  %v1007_v30 = vsel %vm1005_vm1, %v1353_v26, %v1352_v27  ;;  %v1006_v33 = vsel %vm1005_vm1, %v1352_v27, %v1353_v26 }
 0x328   : > { %1261 = vmatprep.subr.bf16.mxu1 %v1260_v29  ;;  %v1264_v34 = vpack.c.bf16 %v1014_v32, %v1007_v30  ;;  %v1016_v36 = vpop.permute.xlu1 %1015  ;;  %v1266_v49 = vpack.c.bf16 %v1013_v35, %v1006_v33 }
 0x329   : > { %v1021_v39 = vsel %vm1019_vm3, %v1018_v37, %v1016_v36  ;;  %v1020_v42 = vsel %vm1019_vm3, %v1016_v36, %v1018_v37 }
 0x32b   : > { %1263 = vmatpush1.bf16.msra.mxu1 %v1262_v31 }
 0x32c   : > { %1265 = vmatprep.subr.bf16.mxu1 %v1264_v34 }
 0x32f   : > { %1267 = vmatpush1.bf16.msra.mxu1 %v1266_v49 }
 0x330   : > { %1042 = vmatprep.subr.mxu1 %v1021_v39 }
 0x333   : > { %1043 = vmatpush1.msra.mxu1 %v1020_v42 }
 0x334   : > { %1196 = vmatmul.mubr.msk.f32.vlgmr.msra.gmra.mrb[2].mxu1 %vm545_vm5, %v1022_v41 }
 0x407   : > { %v1092_v22 = vpop.f32.mrb[2].mxu1 }
 0x408   : > { %1097 = vst [vmem:[%s352_s25] sm:$0xff] %v1092_v22  ;;  %v1094_v45 = vpop.f32.mrb[3].mxu1 }
 0x409   : > { %1098 = vst [vmem:[%s352_s25 + $0x8] sm:$0xff] %v1094_v45 }
 0x40a   : > { %1372 = shalt.err (!%p1369_p3)
}
 0x40b   : > { %s1373_s20 = scalar_lea.hbm %s1852_s30, 256  ;;  %s1377_s28 = scalar_lea.hbm %s1902_s10, 512 }
 0x40c   : > { %p1374_p4 = scmp.ne.s32.totalorder %s1852_s30, %s1373_s20  ;;  %p1378_p9 = scmp.lt.u32.totalorder %s1852_s30, %s1902_s10 }
 0x40d   : > { %p1379_p10 = scmp.lt.u32.totalorder %s1377_s28, %s1373_s20  ;;  %p1381_p12 = scmp.lt.u32.totalorder %s1373_s20, %s1852_s30 }
 0x40e   : > { %p1375_p7 = pnand %p1374_p4, %p1532_p5 }
 0x40f   : > { %p1380_p11 = por %p1379_p10, %p1378_p9 }
 0x410   : > { %p1376_p8 = pneg %p1375_p7 }
 0x411   : > { %p1382_p13 = por %p1381_p12, %p1380_p11 }
 0x413   : > { %p1383_p0 = pnand %p1382_p13, %p1376_p8 }
 0x415   : > { %1386 = shalt.err (!%p1383_p0)
}
 0x416   : > { %1268 = dma.vmem_to_hbm [thread:$0]  (%p1532_p5), %s1847_s26, 256, %s1852_s30, %s1100_s11  }
 0x417 PF: > { %p1274_p1 = scmp.ge.s32.totalorder %s1421_s16, 2  ;;  %s1126_s12 = sand.u32 1, %s1409_s13  }
 0x418   : > { %s1127_s18 = scalar_lea.sflag [#allocation3], %s1126_s12 }
 0x419   : > { %p1271_p2 = pnand %p1274_p1, %p1536_p6 }
 0x41b   : > { %1404 = dma.done.wait (!%p1271_p2), %s1127_s18, 256  }
 0x41c   : > { %1406 = vsyncadd (!%p1271_p2), %s1127_s18, 4294967040  ;;  %p20_p3 = scmp.ge.s32.totalorder %s1519_s19, 4   ;;  %s1905_s13 = smov %s1413_s14 }
 0x41d   : > { %s1906_s14 = smov %s1417_s15  ;;  %s1907_s15 = smov %s1530_s22 }
 0x41e   : > { %s1908_s16 = smov %s1519_s19  ;;  %22 = sbr.rel (!%p20_p3) target bundleno = 3 (0x3), region = 95 }
 0x425   :  { %1132 = vsyncpa [#allocation3], 1 }
 0x426   :  { %1134 = vsyncpa [#allocation3 + $0x1], 1 }

</bundles_post_ra>
